<compile_context>
chip_gen: v7x
topology: tpu7x:2x2x1
jax: 0.10.0
libtpu: 0.0.40
codegen_flags: <defaults>
</compile_context>

<pallas_src>
import functools
import math

import jax
import jax.numpy as jnp
from jax import lax
from jax.experimental import pallas as pl
from jax.experimental.pallas import tpu as pltpu

_LANE = 128
_MASK_VALUE = -1e30


def _flash_qkv_kernel(q_ref, k_ref, v_ref, o_ref, m_scr, l_scr, acc_scr, *,
                      scale2, seq_len, tkv, needs_mask, exp_dtype):
    ki = pl.program_id(3)

    @pl.when(ki == 0)
    def _init():
        m_scr[...] = jnp.full_like(m_scr, -jnp.inf)
        l_scr[...] = jnp.zeros_like(l_scr)
        acc_scr[...] = jnp.zeros_like(acc_scr)

    # Scale hoisted onto the small (ch, tq) q tile instead of the (tkv, tq)
    # logits tile (VPU is the tighter slot for ch <= 64).  Weak-typed scalar
    # keeps the input dtype (bf16 stays bf16 into the MXU).
    q = q_ref[0] * scale2          # (ch, tq)
    k = k_ref[0]                   # (ch, tkv)
    v = v_ref[0]                   # (ch, tkv)
    # Note: for peak MXU rate callers should pass bf16 qkv; f32 matmuls run at
    # a fraction of bf16 rate on all generations.

    # s[kv, t] = sum_c k[c, kv] * q[c, t] -- contract over C, no transposes,
    # so the (1, tq) softmax stats broadcast directly over the (ch, tq) acc.
    # TODO(synk): confirm via a bundle dump that Mosaic uses the MXU's
    # transposed-operand path here (no per-step vxpose of the k tile).
    s = lax.dot_general(k, q, (((0,), (0,)), ((), ())),
                        preferred_element_type=jnp.float32)          # (tkv, tq) f32

    if needs_mask:
        kv_idx = ki * tkv + lax.broadcasted_iota(jnp.int32, (tkv, 1), 0)
        s = jnp.where(kv_idx < seq_len, s, _MASK_VALUE)

    m_prev = m_scr[...]                                               # (1, tq)
    m_new = jnp.maximum(m_prev, jnp.max(s, axis=0, keepdims=True))    # (1, tq)
    alpha = jnp.exp(m_prev - m_new)                                   # (1, tq)
    p = jnp.exp((s - m_new).astype(exp_dtype))                        # (tkv, tq)

    # TODO(synk): if a bundle dump shows VALU/XLU saturation, move this row-sum
    # onto the underutilized MXU (ones-row trick).
    l_scr[...] = alpha * l_scr[...] + jnp.sum(
        p.astype(jnp.float32), axis=0, keepdims=True)
    # acc[c, t] += sum_kv v[c, kv] * p[kv, t]
    acc_scr[...] = alpha * acc_scr[...] + jnp.dot(
        v, p.astype(v.dtype), preferred_element_type=jnp.float32)     # (ch, tq) f32
    m_scr[...] = m_new

    @pl.when(ki == pl.num_programs(3) - 1)
    def _finalize():
        # Normalization runs once per q tile -> exact reciprocal is fine.
        inv_l = pl.reciprocal(l_scr[...], approx=False)               # (1, tq)
        o_ref[0] = (acc_scr[...] * inv_l).astype(o_ref.dtype)


def _vmem_capacity_bytes():
    try:
        return int(pltpu.get_tpu_info().vmem_capacity_bytes)
    except Exception:
        return 64 * 2 ** 20        # v7x-sized fallback (smallest of v5e/v6e/v7x)


def _has_bf16_eup():
    # v6e / v7x EUP+VPU have a bf16 path; v5e (and older) do not.
    try:
        kind = jax.devices()[0].device_kind.lower()
    except Exception:
        return False
    return not any(tag in kind for tag in ("v2", "v3", "v4", "v5"))


def _vmem_bytes_estimate(ch, tq, tkv, itemsize):
    blocks = 2 * (2 * ch * tq + 2 * ch * tkv) * itemsize   # double-buffered q,o,k,v tiles
    scratch = ch * tq * 4 + 2 * tq * 4                     # f32 acc + m + l
    interm = tkv * tq * (8 + itemsize)                     # s(f32) + p + p.astype(v.dtype)
    return blocks + scratch + interm


def _tile_candidates(length_pad, cap):
    cands = []
    t = min(cap, length_pad)
    t -= t % _LANE
    while t >= _LANE:
        if length_pad % t == 0:
            cands.append(t)
        t -= _LANE
    return cands                                            # descending; 128 always present


def _choose_tiles(length_pad, ch, itemsize, parallel_bh):
    vmem_cap = _vmem_capacity_bytes()
    budget = int(0.6 * vmem_cap)                            # headroom for compiler scratch

    tq_cands = _tile_candidates(length_pad, 1024)
    tkv_cands = [length_pad] + [t for t in _tile_candidates(length_pad, 2048)
                                if t != length_pad]

    tq, tkv = _LANE, _LANE
    for cand_tkv in tkv_cands:                              # prefer tkv == T (K/V residency)
        fit = next((t for t in tq_cands
                    if _vmem_bytes_estimate(ch, t, cand_tkv, itemsize) <= budget), None)
        if fit is not None:
            tq, tkv = fit, cand_tkv
            break

    # v7x megacore: keep >= 2 q tiles when batch*heads alone can't feed 2 cores.
    if parallel_bh < 2 and length_pad // tq < 2:
        smaller = [t for t in tq_cands if length_pad // t >= 2]
        if smaller:
            tq = smaller[0]

    return tq, tkv, vmem_cap


def qkv_attention_pallas(qkv, n_heads, *, tq=None, tkv=None, exp_dtype=None):
    """qkv: [N, 3*H*C, T] -> [N, H*C, T]  (same semantics as PyTorch QKVAttention)."""
    bs, width, length = qkv.shape
    assert width % (3 * n_heads) == 0
    ch = width // (3 * n_heads)
    hc = n_heads * ch
    H = n_heads
    assert ch % 8 == 0, "per-head channels must be a multiple of 8"
    # For bf16 inputs ch % 16 == 0 (int8/fp8: ch % 32) avoids padded sublane tiles.
    # TODO(synk): zero-pad ch (and slice the output) if a model uses ch % 8 != 0.

    itemsize = jnp.dtype(qkv.dtype).itemsize

    # Pad T up to a multiple of 128 so every tile is lane-aligned; padded keys
    # are masked in-kernel, padded query columns are sliced off afterwards.
    length_pad = ((length + _LANE - 1) // _LANE) * _LANE
    needs_mask = length_pad != length
    if needs_mask:
        qkv = jnp.pad(qkv, ((0, 0), (0, 0), (0, length_pad - length)))

    if tq is None or tkv is None:
        auto_tq, auto_tkv, vmem_cap = _choose_tiles(length_pad, ch, itemsize, bs * H)
        tq = auto_tq if tq is None else tq
        tkv = auto_tkv if tkv is None else tkv
    else:
        vmem_cap = _vmem_capacity_bytes()
    assert length_pad % tq == 0 and tq % _LANE == 0
    assert length_pad % tkv == 0 and tkv % _LANE == 0

    if exp_dtype is None:
        exp_dtype = (jnp.bfloat16
                     if (qkv.dtype == jnp.bfloat16 and _has_bf16_eup())
                     else jnp.float32)

    needed = _vmem_bytes_estimate(ch, tq, tkv, itemsize)
    vmem_limit = int(min(0.9 * vmem_cap, max(1.5 * needed, 32 * 2 ** 20)))

    grid = (bs, H, length_pad // tq, length_pad // tkv)

    # Index straight into the packed qkv tensor (block units of `ch` along dim 1):
    # chunk*H + head selects the right channel slab with no wrapper-side copies.
    # With tkv == T the k/v block index is independent of qi, so K/V stay
    # resident in VMEM across all q tiles of a (batch, head).
    q_spec = pl.BlockSpec((1, ch, tq), lambda n, h, qi, ki: (n, 0 * H + h, qi))
    k_spec = pl.BlockSpec((1, ch, tkv), lambda n, h, qi, ki: (n, 1 * H + h, ki))
    v_spec = pl.BlockSpec((1, ch, tkv), lambda n, h, qi, ki: (n, 2 * H + h, ki))
    o_spec = pl.BlockSpec((1, ch, tq), lambda n, h, qi, ki: (n, h, qi))
    # TODO(synk): on v5e, if a profile shows exposed K/V DMA waits in the
    # multi-kv-tile fallback, add pipeline_mode=pl.Buffered(3) to k_spec/v_spec.

    scale2 = 1.0 / math.sqrt(ch)   # (ch**-0.25 on q) * (ch**-0.25 on k) = ch**-0.5
    kernel = functools.partial(_flash_qkv_kernel, scale2=scale2, seq_len=length,
                               tkv=tkv, needs_mask=needs_mask, exp_dtype=exp_dtype)

    out = pl.pallas_call(
        kernel,
        out_shape=jax.ShapeDtypeStruct((bs, hc, length_pad), qkv.dtype),
        grid_spec=pltpu.PrefetchScalarGridSpec(
            num_scalar_prefetch=0,
            grid=grid,
            in_specs=[q_spec, k_spec, v_spec],
            out_specs=o_spec,
            scratch_shapes=[
                pltpu.VMEM((1, tq), jnp.float32),    # running max  m
                pltpu.VMEM((1, tq), jnp.float32),    # running sum  l
                pltpu.VMEM((ch, tq), jnp.float32),   # output accumulator
            ],
        ),
        compiler_params=pltpu.CompilerParams(
            dimension_semantics=("parallel", "parallel", "parallel", "arbitrary"),
            vmem_limit_bytes=vmem_limit),
    )(qkv, qkv, qkv)

    if needs_mask:
        out = out[:, :, :length]
    return out


def qkv_attention_ref(qkv, n_heads):
    """Pure-JAX reference mirroring the PyTorch forward."""
    bs, width, length = qkv.shape
    ch = width // (3 * n_heads)
    hc = n_heads * ch
    q = qkv[:, 0 * hc:1 * hc, :].reshape(bs * n_heads, ch, length)
    k = qkv[:, 1 * hc:2 * hc, :].reshape(bs * n_heads, ch, length)
    v = qkv[:, 2 * hc:3 * hc, :].reshape(bs * n_heads, ch, length)
    scale = 1.0 / math.sqrt(math.sqrt(ch))
    w = jnp.einsum('bct,bcs->bts', q * scale, k * scale)
    w = jax.nn.softmax(w.astype(jnp.float32), axis=-1).astype(qkv.dtype)
    a = jnp.einsum('bts,bcs->bct', w, v)
    return a.reshape(bs, hc, length)


if __name__ == "__main__":
    key = jax.random.PRNGKey(0)

    # Config 1: T a multiple of 128 -> aligned tiled path, no masking.
    n_heads, N, C, T = 2, 2, 16, 128
    qkv = jax.random.normal(key, (N, 3 * n_heads * C, T), dtype=jnp.float32)
    out = jax.block_until_ready(qkv_attention_pallas(qkv, n_heads))
    ref = qkv_attention_ref(qkv, n_heads)
    assert out.shape == (N, n_heads * C, T)
    assert jnp.allclose(out, ref, atol=1e-4, rtol=1e-4), "mismatch vs reference (tiled)"

    # Config 2: small, non-multiple-of-128 T -> zero-pad + in-kernel key masking.
    n_heads2, N2, C2, T2 = 3, 1, 8, 48
    qkv2 = jax.random.normal(key, (N2, 3 * n_heads2 * C2, T2), dtype=jnp.float32)
    out2 = jax.block_until_ready(qkv_attention_pallas(qkv2, n_heads2))
    ref2 = qkv_attention_ref(qkv2, n_heads2)
    assert out2.shape == (N2, n_heads2 * C2, T2)
    assert jnp.allclose(out2, ref2, atol=1e-4, rtol=1e-4), "mismatch vs reference (masked)"

    # Config 3: forced small tiles -> exercises the multi-kv-step online softmax.
    n_heads3, N3, C3, T3 = 2, 1, 32, 256
    qkv3 = jax.random.normal(key, (N3, 3 * n_heads3 * C3, T3), dtype=jnp.float32)
    out3 = jax.block_until_ready(qkv_attention_pallas(qkv3, n_heads3, tq=128, tkv=128))
    ref3 = qkv_attention_ref(qkv3, n_heads3)
    assert out3.shape == (N3, n_heads3 * C3, T3)
    assert jnp.allclose(out3, ref3, atol=1e-4, rtol=1e-4), "mismatch vs reference (multi-kv)"

    print("KERNEL_OK")
</pallas_src>

<mosaic_0001>
module attributes {stable_mosaic.version = 11 : i64} {
  func.func @_flash_qkv_kernel(%arg0: i32, %arg1: i32, %arg2: i32, %arg3: i32, %arg4: memref<1x16x128xf32, #tpu.memory_space<vmem>>, %arg5: memref<1x16x128xf32, #tpu.memory_space<vmem>>, %arg6: memref<1x16x128xf32, #tpu.memory_space<vmem>>, %arg7: memref<1x16x128xf32, #tpu.memory_space<vmem>>, %arg8: memref<1x128xf32, #tpu.memory_space<vmem>>, %arg9: memref<1x128xf32, #tpu.memory_space<vmem>>, %arg10: memref<16x128xf32, #tpu.memory_space<vmem>>) attributes {dimension_semantics = [#tpu.dimension_semantics<parallel>, #tpu.dimension_semantics<parallel>, #tpu.dimension_semantics<parallel>, #tpu.dimension_semantics<arbitrary>], iteration_bounds = array<i64: 2, 2, 1, 1>, scalar_prefetch = 0 : i64, scratch_operands = 3 : i64, tpu.core_type = #tpu.core_type<tc>, window_params = [{transform_indices = @transform_0, window_bounds = array<i64: 1, 16, 128>}, {transform_indices = @transform_1, window_bounds = array<i64: 1, 16, 128>}, {transform_indices = @transform_2, window_bounds = array<i64: 1, 16, 128>}, {transform_indices = @transform_3, window_bounds = array<i64: 1, 16, 128>}]} {
    %c0_i32 = arith.constant 0 : i32
    %0 = arith.cmpi eq, %arg3, %c0_i32 : i32
    %1 = arith.extui %0 : i1 to i32
    %c0_i32_0 = arith.constant 0 : i32
    %2 = arith.cmpi ne, %1, %c0_i32_0 : i32
    scf.if %2 {
      %cst_27 = arith.constant 0xFF800000 : f32
      %37 = vector.broadcast %cst_27 : f32 to vector<1x128xf32>
      %c0_28 = arith.constant 0 : index
      %c0_29 = arith.constant 0 : index
      %38 = vector.load %arg8[%c0_28, %c0_29] : memref<1x128xf32, #tpu.memory_space<vmem>>, vector<1x128xf32>
      tpu.vector_store %arg8[%c0_28, %c0_29], %37 {strides = array<i32>} : memref<1x128xf32, #tpu.memory_space<vmem>>, vector<1x128xf32>,
      %cst_30 = arith.constant 0.000000e+00 : f32
      %39 = vector.broadcast %cst_30 : f32 to vector<1x128xf32>
      %c0_31 = arith.constant 0 : index
      %c0_32 = arith.constant 0 : index
      %40 = vector.load %arg9[%c0_31, %c0_32] : memref<1x128xf32, #tpu.memory_space<vmem>>, vector<1x128xf32>
      tpu.vector_store %arg9[%c0_31, %c0_32], %39 {strides = array<i32>} : memref<1x128xf32, #tpu.memory_space<vmem>>, vector<1x128xf32>,
      %cst_33 = arith.constant 0.000000e+00 : f32
      %41 = vector.broadcast %cst_33 : f32 to vector<16x128xf32>
      %c0_34 = arith.constant 0 : index
      %c0_35 = arith.constant 0 : index
      %42 = vector.load %arg10[%c0_34, %c0_35] : memref<16x128xf32, #tpu.memory_space<vmem>>, vector<16x128xf32>
      tpu.vector_store %arg10[%c0_34, %c0_35], %41 {strides = array<i32>} : memref<16x128xf32, #tpu.memory_space<vmem>>, vector<16x128xf32>,
    } else {
    }
    %c0 = arith.constant 0 : index
    %c0_1 = arith.constant 0 : index
    %c0_2 = arith.constant 0 : index
    %3 = vector.load %arg4[%c0, %c0_1, %c0_2] : memref<1x16x128xf32, #tpu.memory_space<vmem>>, vector<1x16x128xf32>
    %4 = vector.shape_cast %3 : vector<1x16x128xf32> to vector<16x128xf32>
    %cst = arith.constant 2.500000e-01 : f32
    %5 = vector.broadcast %cst : f32 to vector<16x128xf32>
    %6 = arith.mulf %4, %5 : vector<16x128xf32>
    %c0_3 = arith.constant 0 : index
    %c0_4 = arith.constant 0 : index
    %c0_5 = arith.constant 0 : index
    %7 = vector.load %arg5[%c0_3, %c0_4, %c0_5] : memref<1x16x128xf32, #tpu.memory_space<vmem>>, vector<1x16x128xf32>
    %8 = vector.shape_cast %7 : vector<1x16x128xf32> to vector<16x128xf32>
    %c0_6 = arith.constant 0 : index
    %c0_7 = arith.constant 0 : index
    %c0_8 = arith.constant 0 : index
    %9 = vector.load %arg6[%c0_6, %c0_7, %c0_8] : memref<1x16x128xf32, #tpu.memory_space<vmem>>, vector<1x16x128xf32>
    %10 = vector.shape_cast %9 : vector<1x16x128xf32> to vector<16x128xf32>
    %cst_9 = arith.constant dense<0.000000e+00> : vector<128x128xf32>
    %11 = tpu.matmul %8, %6, %cst_9 {dimension_numbers = #tpu.dot_dimension_numbers<[0], [0], [1], [1], [0, 1, 1, 1], [], []>} : vector<16x128xf32>, vector<16x128xf32>, vector<128x128xf32> -> vector<128x128xf32>
    %c0_10 = arith.constant 0 : index
    %c0_11 = arith.constant 0 : index
    %12 = vector.load %arg8[%c0_10, %c0_11] : memref<1x128xf32, #tpu.memory_space<vmem>>, vector<1x128xf32>
    %cst_12 = arith.constant dense<0xFF800000> : vector<128xf32>
    %13 = vector.multi_reduction <maximumf>, %11, %cst_12 [0] : vector<128x128xf32> to vector<128xf32>
    %14 = vector.shape_cast %13 : vector<128xf32> to vector<1x128xf32>
    %15 = arith.maximumf %12, %14 : vector<1x128xf32>
    %16 = arith.subf %12, %15 : vector<1x128xf32>
    %17 = math.exp %16 : vector<1x128xf32>
    %18 = vector.broadcast %15 : vector<1x128xf32> to vector<128x128xf32>
    %19 = arith.subf %11, %18 : vector<128x128xf32>
    %20 = math.exp %19 : vector<128x128xf32>
    %c0_13 = arith.constant 0 : index
    %c0_14 = arith.constant 0 : index
    %21 = vector.load %arg9[%c0_13, %c0_14] : memref<1x128xf32, #tpu.memory_space<vmem>>, vector<1x128xf32>
    %22 = arith.mulf %17, %21 : vector<1x128xf32>
    %cst_15 = arith.constant dense<0.000000e+00> : vector<128xf32>
    %23 = vector.multi_reduction <add>, %20, %cst_15 [0] : vector<128x128xf32> to vector<128xf32>
    %24 = vector.shape_cast %23 : vector<128xf32> to vector<1x128xf32>
    %25 = arith.addf %22, %24 : vector<1x128xf32>
    %c0_16 = arith.constant 0 : index
    %c0_17 = arith.constant 0 : index
    %26 = vector.load %arg9[%c0_16, %c0_17] : memref<1x128xf32, #tpu.memory_space<vmem>>, vector<1x128xf32>
    tpu.vector_store %arg9[%c0_16, %c0_17], %25 {strides = array<i32>} : memref<1x128xf32, #tpu.memory_space<vmem>>, vector<1x128xf32>,
    %c0_18 = arith.constant 0 : index
    %c0_19 = arith.constant 0 : index
    %27 = vector.load %arg10[%c0_18, %c0_19] : memref<16x128xf32, #tpu.memory_space<vmem>>, vector<16x128xf32>
    %28 = vector.broadcast %17 : vector<1x128xf32> to vector<16x128xf32>
    %29 = arith.mulf %28, %27 : vector<16x128xf32>
    %cst_20 = arith.constant dense<0.000000e+00> : vector<16x128xf32>
    %30 = tpu.matmul %10, %20, %cst_20 {dimension_numbers = #tpu.dot_dimension_numbers<[1], [0], [0], [1], [0, 0, 1, 1], [], []>} : vector<16x128xf32>, vector<128x128xf32>, vector<16x128xf32> -> vector<16x128xf32>
    %31 = arith.addf %29, %30 : vector<16x128xf32>
    %c0_21 = arith.constant 0 : index
    %c0_22 = arith.constant 0 : index
    %32 = vector.load %arg10[%c0_21, %c0_22] : memref<16x128xf32, #tpu.memory_space<vmem>>, vector<16x128xf32>
    tpu.vector_store %arg10[%c0_21, %c0_22], %31 {strides = array<i32>} : memref<16x128xf32, #tpu.memory_space<vmem>>, vector<16x128xf32>,
    %c0_23 = arith.constant 0 : index
    %c0_24 = arith.constant 0 : index
    %33 = vector.load %arg8[%c0_23, %c0_24] : memref<1x128xf32, #tpu.memory_space<vmem>>, vector<1x128xf32>
    tpu.vector_store %arg8[%c0_23, %c0_24], %15 {strides = array<i32>} : memref<1x128xf32, #tpu.memory_space<vmem>>, vector<1x128xf32>,
    %c0_i32_25 = arith.constant 0 : i32
    %34 = arith.cmpi eq, %arg3, %c0_i32_25 : i32
    %35 = arith.extui %34 : i1 to i32
    %c0_i32_26 = arith.constant 0 : i32
    %36 = arith.cmpi ne, %35, %c0_i32_26 : i32
    scf.if %36 {
      %c0_27 = arith.constant 0 : index
      %c0_28 = arith.constant 0 : index
      %37 = vector.load %arg9[%c0_27, %c0_28] : memref<1x128xf32, #tpu.memory_space<vmem>>, vector<1x128xf32>
      %38 = tpu.reciprocal %37 : vector<1x128xf32> -> vector<1x128xf32>
      %c0_29 = arith.constant 0 : index
      %c0_30 = arith.constant 0 : index
      %39 = vector.load %arg10[%c0_29, %c0_30] : memref<16x128xf32, #tpu.memory_space<vmem>>, vector<16x128xf32>
      %40 = vector.broadcast %38 : vector<1x128xf32> to vector<16x128xf32>
      %41 = arith.mulf %39, %40 : vector<16x128xf32>
      %c0_31 = arith.constant 0 : index
      %c0_32 = arith.constant 0 : index
      %c0_33 = arith.constant 0 : index
      %42 = vector.load %arg7[%c0_31, %c0_32, %c0_33] : memref<1x16x128xf32, #tpu.memory_space<vmem>>, vector<1x16x128xf32>
      %43 = vector.shape_cast %42 : vector<1x16x128xf32> to vector<16x128xf32>
      %44 = vector.shape_cast %41 : vector<16x128xf32> to vector<1x16x128xf32>
      tpu.vector_store %arg7[%c0_31, %c0_32, %c0_33], %44 {strides = array<i32>} : memref<1x16x128xf32, #tpu.memory_space<vmem>>, vector<1x16x128xf32>,
    } else {
    }
    return
  }
  func.func @transform_0(%arg0: i32, %arg1: i32, %arg2: i32, %arg3: i32) -> (i32, i32, i32) {
    %c0_i32 = arith.constant 0 : i32
    %0 = arith.addi %c0_i32, %arg1 : i32
    %c0_i32_0 = arith.constant 0 : i32
    return %arg0, %0, %arg2 : i32, i32, i32
  }
  func.func @transform_1(%arg0: i32, %arg1: i32, %arg2: i32, %arg3: i32) -> (i32, i32, i32) {
    %c2_i32 = arith.constant 2 : i32
    %0 = arith.addi %c2_i32, %arg1 : i32
    %c0_i32 = arith.constant 0 : i32
    return %arg0, %0, %arg3 : i32, i32, i32
  }
  func.func @transform_2(%arg0: i32, %arg1: i32, %arg2: i32, %arg3: i32) -> (i32, i32, i32) {
    %c4_i32 = arith.constant 4 : i32
    %0 = arith.addi %c4_i32, %arg1 : i32
    %c0_i32 = arith.constant 0 : i32
    return %arg0, %0, %arg3 : i32, i32, i32
  }
  func.func @transform_3(%arg0: i32, %arg1: i32, %arg2: i32, %arg3: i32) -> (i32, i32, i32) {
    %c0_i32 = arith.constant 0 : i32
    return %arg0, %arg1, %arg2 : i32, i32, i32
  }
}

</mosaic_0001>

<bundles_post_ra>
// kernel: tpu_custom_call.1
= control target key start
LH: loop header
LB: loop body
LE: loop exit
PB: predicated region body
PF: predicated region fallthrough
CT: control target
= control target key end

     0   :  { %s2084_s0 = inlined_call_operand.hbm [shape: f32[2,96,128], index: 0, kind: input, shape index: {}]   ;;  %s2085_s1 = inlined_call_operand.hbm [shape: f32[2,96,128], index: 1, kind: input, shape index: {}]   ;;  %s2086_s2 = inlined_call_operand.hbm [shape: f32[2,96,128], index: 2, kind: input, shape index: {}]   ;;  %s2087_s3 = inlined_call_operand.hbm [shape: f32[2,32,128], index: 3, kind: output, shape index: {}]  }
   0x1   :  { %2106 = sst [smem:[#allocation25_spill]] %s2084_s0 }
   0x2   :  { %2107 = sst [smem:[#allocation26_spill]] %s2085_s1 }
   0x3   :  { %2108 = sst [smem:[#allocation27_spill]] %s2087_s3 }
   0x4   :  { %8 = vsyncpa [#allocation6], 0 }
   0x5   :  { %10 = vsyncpa [#allocation6 + $0x1], 0 }
   0x6   :  { %11 = vsyncpa [#allocation9], 0 }
   0x7   :  { %13 = vsyncpa [#allocation9 + $0x1], 0 }
   0x8   :  { %14 = vsyncpa [#allocation7], 0 }
   0x9   :  { %16 = vsyncpa [#allocation7 + $0x1], 0  ;;  %s1583_s12 = smov 0   ;;  %s1585_s13 = smov 0  }
   0xa   :  { %s1587_s14 = smov 0   ;;  %s1589_s15 = smov 0  }
   0xb   :  { %s1591_s16 = smov 0   ;;  %s1593_s17 = smov 0  }
   0xc   :  { %s1595_s18 = smov 0   ;;  %s1597_s19 = smov 0  }
   0xd   :  { %s1599_s20 = smov 0   ;;  %s1601_s21 = smov 0  }
   0xe   :  { %s1603_s22 = smov 0   ;;  %s1605_s23 = smov 0  }
   0xf   :  { %s1607_s24 = smov 0   ;;  %s1609_s25 = smov 0  }
  0x10 LB: > { %2109 = sst [smem:[#allocation16_spill]] %s1515_s16  ;;  %s1654_s26 = sadd.s32 4294967295, %s1551_s25   ;;  %s1551_s25 = sphi %s1609_s25, %s22_s25   ;;  %s1547_s24 = sphi %s1607_s24, %s2159_s24   ;;  %s1543_s23 = sphi %s1605_s23, %s2158_s23   ;;  %s1539_s22 = sphi %s1603_s22, %s2157_s22   ;;  %s1535_s21 = sphi %s1601_s21, %s2156_s21   ;;  %s1531_s20 = sphi %s1599_s20, %s2167_s20   ;;  %s1527_s19 = sphi %s1597_s19, %s2166_s19   ;;  %s1523_s18 = sphi %s1595_s18, %s2165_s18   ;;  %s1519_s17 = sphi %s1593_s17, %s2164_s17   ;;  %s1515_s16 = sphi %s1591_s16, %s2163_s16   ;;  %s1511_s15 = sphi %s1589_s15, %s2153_s15   ;;  %s1507_s14 = sphi %s1587_s14, %s2162_s14   ;;  %s1503_s13 = sphi %s1585_s13, %s2161_s13   ;;  %s1499_s12 = sphi %s1583_s12, %s2160_s12  }
  0x11   : > { %2110 = sst [smem:[#allocation17_spill]] %s1535_s21  ;;  %s44_s27 = sadd.s32 1, %s1543_s23 }
  0x12   : > { %2111 = sst [smem:[#allocation18_spill]] %s1539_s22  ;;  %p46_p0 = scmp.ge.s32.totalorder %s44_s27, 2 }
  0x13   : > { %2112 = sst [smem:[#allocation19_spill]] %s1543_s23  ;;  %s48_s28 = sadd.s32 1, %s1547_s24 }
  0x14   : > { %2113 = sst [smem:[#allocation20_spill]] %s1547_s24  ;;  %p2095_p1 = scmp.eq.s32.totalorder %s1551_s25, 0 }
  0x15   : > { %p2094_p2 = scmp.eq.s32.totalorder %s1654_s26, 0  ;;  %s2169_s27 = smov (%p46_p0, %s44_s27), 0 }
  0x16   : > { %2114 = sst [smem:[#allocation21_spill]] %s2169_s27  ;;  %s2171_s28 = smov (!%p46_p0, %s48_s28), %s1547_s24 }
  0x17   : > { %s82_s29 = sadd.s32 2, %s1543_s23  ;;  %s83_s30 = sadd.s32 2, %s2169_s27 }
  0x18   : > { %p50_p3 = scmp.ge.s32.totalorder %s2171_s28, 2  ;;  %s85_s4 = ssub.s32 %s82_s29, %s83_s30 }
  0x19   : > { %s91_s5 = sadd.s32 1, %s1519_s17  ;;  %p98_p4 = scmp.ne.s32.totalorder %s1519_s17, %s1515_s16 }
  0x1a   : > { %s2173_s28 = smov (%p50_p3, %s2171_s28), 0  ;;  %p104_p6 = scmp.ne.s32.totalorder %s1515_s16, %s1511_s15 }
  0x1b   : > { %2115 = sst [smem:[#allocation22_spill]] %s2173_s28  ;;  %p1672_p5 = por %p98_p4, %p2095_p1 }
  0x1c   : > { %s1680_s7 = ssub.s32 %s1547_s24, %s2173_s28  ;;  %s114_s8 = sadd.s32 4, %s1543_s23 }
  0x1d   : > { %s86_s9 = sor.u32 %s85_s4, %s1680_s7  ;;  %p1686_p7 = por %p104_p6, %p2094_p2 }
  0x1e   : > { %p89_p8 = scmp.eq.s32.totalorder %s86_s9, 0  ;;  %s115_s11 = sadd.s32 4, %s2169_s27 }
  0x1f   : > { %s2117_s10 = scalar_select %p1686_p7, 1, 0 }
  0x20   : > { %s117_s29 = ssub.s32 %s114_s8, %s115_s11  ;;  %p2093_p9 = scmp.lt.s32.totalorder %s1551_s25, 4 }
  0x21   : > { %2118 = sst [smem:[#allocation23_spill]] %s2117_s10  ;;  %s118_s15 = sor.u32 %s117_s29, %s1680_s7 }
  0x22   : > { %s1692_s30 = scalar_select %p89_p8, %s1519_s17, %s91_s5  }
  0x23   : > { %p1696_p10 = scmp.eq.s32.totalorder %s118_s15, 0  ;;  %s956_s4 = sshll.u32 %s1543_s23, 1 }
  0x24   : > { %2119 = sst [smem:[#allocation24_spill]] %s1692_s30  ;;  %s1126_s3 = smul.u32 12, %s1547_s24 }
  0x25   : > { %s214_s22 = sand.u32 1, %s1551_s25   ;;  %s216_s8 = sand.u32 1, %s1519_s17  }
  0x26   : > { %s201_s21 = sadd.s32 %s1126_s3, %s956_s4  ;;  %s958_s9 = sshll.u32 %s216_s8, 4 }
  0x27   : > { %s1703_s10 = sshll.u32 %s201_s21, 7  ;;  %s2121_s1 = sld [smem:[#allocation26_spill]] }
  0x28   : > { %s218_s15 = scalar_lea.vmem [#allocation8], %s958_s9  ;;  %p1716_p11 = pnand %p2093_p9, %p1672_p5 }
  0x29   : > { %s229_s16 = sshll.u32 %s218_s15, 4  ;;  %s1724_s21 = scalar_lea.sflag [#allocation9], %s214_s22  ;;  %s1720_s16 = int_to_ptr.vmem [resolvable:$true] %s229_s16 }
  0x2a   : > { %p1307_p3 = pneg %p1716_p11 }
  0x2d   : > { %s847_s29 = scalar_lea.hbm %s2121_s1, %s1703_s10  ;;  %s1310_s9 = scalar_lea.hbm %s2121_s1, 3072 }
  0x2e   : > { %s1710_s30 = scalar_lea.hbm %s847_s29, 512  ;;  %s1335_s4 = scalar_lea.hbm %s847_s29, 768 }
  0x2f   : > { %p1306_p0 = scmp.ne.s32.totalorder %s1710_s30, %s1335_s4  ;;  %p1311_p5 = scmp.lt.u32.totalorder %s1710_s30, %s2121_s1 }
  0x30   : > { %p1312_p8 = scmp.lt.u32.totalorder %s1310_s9, %s1335_s4  ;;  %p1314_p2 = scmp.lt.u32.totalorder %s1335_s4, %s1710_s30 }
  0x31   : > { %p1308_p4 = pnand %p1307_p3, %p1306_p0 }
  0x32   : > { %p1313_p9 = por %p1312_p8, %p1311_p5 }
  0x33   : > { %p1309_p6 = pneg %p1308_p4 }
  0x34   : > { %p1315_p1 = por %p1314_p2, %p1313_p9 }
  0x36   : > { %p1316_p12 = pnand %p1315_p1, %p1309_p6 }
  0x38   : > { %1319 = shalt.err (!%p1316_p12)
}
  0x39   : > { %s1320_s22 = scalar_lea.vmem %s1720_s16, 256  ;;  %s1553_s29 = smov [#allocation8]  }
  0x3a   : > { %p1321_p0 = scmp.ne.s32.totalorder %s1720_s16, %s1320_s22  ;;  %s1325_s15 = sshll.u32 %s1553_s29, 4  ;;  %s1326_s15 = int_to_ptr.vmem [resolvable:$false] %s1325_s15 }
  0x3b   : > { %s1327_s6 = scalar_lea.vmem %s1326_s15, 512  ;;  %p1328_p7 = scmp.lt.s32.totalorder %s1720_s16, %s1326_s15 }
  0x3c   : > { %p1323_p4 = pnand %p1321_p0, %p1307_p3  ;;  %p1329_p5 = scmp.lt.s32.totalorder %s1327_s6, %s1320_s22 }
  0x3e   : > { %p1324_p13 = pneg %p1323_p4  ;;  %p1330_p8 = por %p1329_p5, %p1328_p7 }
  0x40   : > { %p1331_p2 = pnand %p1330_p8, %p1324_p13 }
  0x42   : > { %1334 = shalt.err (!%p1331_p2)
}
  0x43   : > { %s2097_s4 = smov 128   ;;  %s2099_s8 = smov 8  }
  0x44   : > { %1141 = dma.hbm_to_vmem [thread:$0]  (!%p1716_p11), %s1710_s30, 256, %s1720_s16, %s1724_s21, %s2097_s4, %s2097_s4, %s2099_s8  }
  0x45   : > { %p2123_p1 = scmp.lt.s32.totalorder %s1551_s25, 5  ;;  %p2124_p7 = scmp.ge.s32.totalorder %s1551_s25, 1 }
  0x46   : > { %s952_s11 = sadd.s32 4294967294, %s1551_s25   ;;  %s53_s5 = ssub.s32 %s1543_s23, %s2169_s27 }
  0x47   : > { %p1758_p9 = pnand %p2124_p7, %p2123_p1  ;;  %s59_s22 = sadd.s32 1, %s1531_s20 }
  0x48   : > { %s54_s29 = sor.u32 %s53_s5, %s1680_s7  ;;  %p66_p12 = scmp.ne.s32.totalorder %s1531_s20, %s1527_s19 }
  0x49   : > { %s2125_s9 = scalar_select %p1758_p9, 1, 0 }
  0x4a   : > { %p57_p13 = scmp.eq.s32.totalorder %s54_s29, 0  ;;  %p72_p3 = scmp.ne.s32.totalorder %s1527_s19, %s1523_s18 }
  0x4b   : > { %p2126_p6 = scmp.eq.s32.totalorder %s1551_s25, 0  ;;  %p164_p11 = scmp.eq.s32.totalorder %s1654_s26, 3 }
  0x4c   : > { %s1779_s16 = scalar_select %p57_p13, %s1531_s20, %s59_s22  }
  0x4d   : > { %p1773_p0 = por %p2126_p6, %p66_p12  ;;  %p2128_p4 = scmp.eq.s32.totalorder %s1654_s26, 0 }
  0x4e   : > { %p1787_p8 = por %p164_p11, %p66_p12  ;;  %p170_p2 = scmp.eq.s32.totalorder %s952_s11, 3 }
  0x4f   : > { %p1783_p5 = por %p2128_p4, %p72_p3  ;;  %s190_s15 = sand.u32 1, %s1531_s20  }
  0x50   : > { %s2130_s7 = scalar_select %p1787_p8, 1, 0 }
  0x51   : > { %s2129_s30 = scalar_select %p1783_p5, 1, 0 }
  0x52   : > { %s955_s6 = sshll.u32 %s190_s15, 4  ;;  %p1792_p1 = por %p170_p2, %p72_p3 }
  0x53   : > { %s2132_s0 = sld [smem:[#allocation25_spill]]  ;;  %s194_s8 = scalar_lea.vmem [#allocation5], %s955_s6 }
  0x54   : > { %s2131_s5 = scalar_select %p1792_p1, 1, 0 }
  0x55   : > { %s204_s1 = sshll.u32 %s194_s8, 4  ;;  %p2133_p7 = scmp.lt.s32.totalorder %s1551_s25, 4  ;;  %s1802_s1 = int_to_ptr.vmem [resolvable:$true] %s204_s1 }
  0x56   : > { %s1812_s27 = scalar_lea.sflag [#allocation6], %s190_s15 }
  0x57   : > { %p1808_p12 = pnand %p2133_p7, %p1773_p0 }
  0x59   : > { %s1800_s22 = scalar_lea.hbm %s2132_s0, %s1703_s10  ;;  %p1338_p3 = pneg %p1808_p12 }
  0x5a   : > { %s1336_s4 = scalar_lea.hbm %s1800_s22, 256  ;;  %s1341_s3 = scalar_lea.hbm %s2132_s0, 3072 }
  0x5b   : > { %p1337_p13 = scmp.ne.s32.totalorder %s1800_s22, %s1336_s4  ;;  %p1342_p0 = scmp.lt.u32.totalorder %s1800_s22, %s2132_s0 }
  0x5c   : > { %p1343_p4 = scmp.lt.u32.totalorder %s1341_s3, %s1336_s4  ;;  %p1345_p7 = scmp.lt.u32.totalorder %s1336_s4, %s1800_s22 }
  0x5d   : > { %p1339_p6 = pnand %p1338_p3, %p1337_p13 }
  0x5e   : > { %p1344_p2 = por %p1343_p4, %p1342_p0 }
  0x5f   : > { %p1340_p11 = pneg %p1339_p6 }
  0x60   : > { %p1346_p1 = por %p1345_p7, %p1344_p2 }
  0x62   : > { %p1347_p8 = pnand %p1346_p1, %p1340_p11 }
  0x64   : > { %1350 = shalt.err (!%p1347_p8)
}
  0x65   : > { %s1351_s15 = scalar_lea.vmem %s1802_s1, 256  ;;  %s1556_s8 = smov [#allocation5]  }
  0x66   : > { %p1352_p13 = scmp.ne.s32.totalorder %s1802_s1, %s1351_s15  ;;  %s1356_s6 = sshll.u32 %s1556_s8, 4  ;;  %s1357_s6 = int_to_ptr.vmem [resolvable:$false] %s1356_s6 }
  0x67   : > { %s1358_s24 = scalar_lea.vmem %s1357_s6, 512  ;;  %p1359_p9 = scmp.lt.s32.totalorder %s1802_s1, %s1357_s6 }
  0x68   : > { %p1354_p6 = pnand %p1352_p13, %p1338_p3  ;;  %p1360_p0 = scmp.lt.s32.totalorder %s1358_s24, %s1351_s15 }
  0x6a   : > { %p1355_p5 = pneg %p1354_p6  ;;  %p1361_p4 = por %p1360_p0, %p1359_p9 }
  0x6c   : > { %p1362_p2 = pnand %p1361_p4, %p1355_p5 }
  0x6e   : > { %1365 = shalt.err (!%p1362_p2)
}
  0x6f   : > { %s2135_s4 = smov 8   ;;  %s2136_s3 = smov 128  }
  0x70   : > { %1138 = dma.hbm_to_vmem [thread:$0]  (!%p1808_p12), %s1800_s22, 256, %s1802_s1, %s1812_s27, %s2136_s3, %s2136_s3, %s2135_s4  }
  0x71   : > { %s123_s11 = sadd.s32 1, %s1507_s14  ;;  %p130_p9 = scmp.ne.s32.totalorder %s1507_s14, %s1503_s13 }
  0x72   : > { %s1847_s29 = scalar_select %p1696_p10, %s1507_s14, %s123_s11  }
  0x73   : > { %p136_p5 = scmp.ne.s32.totalorder %s1503_s13, %s1499_s12  ;;  %s241_s15 = sand.u32 1, %s1507_s14  }
  0x74   : > { %s857_s24 = scalar_lea.hbm %s2086_s2, %s1703_s10  ;;  %p2137_p8 = scmp.eq.s32.totalorder %s1551_s25, 0 }
  0x75   : > { %p2138_p3 = scmp.eq.s32.totalorder %s1654_s26, 0  ;;  %s961_s23 = sshll.u32 %s241_s15, 4 }
  0x76   : > { %p132_p1 = por %p130_p9, %p2137_p8  ;;  %s1866_s1 = scalar_lea.hbm %s857_s24, 1024 }
  0x77   : > { %p1862_p11 = por %p136_p5, %p2138_p3  ;;  %p2140_p12 = scmp.lt.s32.totalorder %s1551_s25, 4 }
  0x78   : > { %s243_s27 = scalar_lea.vmem [#allocation10], %s961_s23  ;;  %s1396_s10 = scalar_lea.hbm %s857_s24, 1280 }
  0x79   : > { %p1870_p10 = pnand %p2140_p12, %p132_p1  ;;  %s254_s28 = sshll.u32 %s243_s27, 4  ;;  %s1874_s28 = int_to_ptr.vmem [resolvable:$true] %s254_s28 }
  0x7a   : > { %p1367_p7 = scmp.ne.s32.totalorder %s1866_s1, %s1396_s10  ;;  %s1371_s15 = scalar_lea.hbm %s2086_s2, 3072 }
  0x7b   : > { %p1368_p13 = pneg %p1870_p10  ;;  %p1372_p4 = scmp.lt.u32.totalorder %s1866_s1, %s2086_s2 }
  0x7c   : > { %p1373_p2 = scmp.lt.u32.totalorder %s1371_s15, %s1396_s10  ;;  %p1375_p5 = scmp.lt.u32.totalorder %s1396_s10, %s1866_s1 }
  0x7d   : > { %p1369_p6 = pnand %p1368_p13, %p1367_p7 }
  0x7e   : > { %p1374_p9 = por %p1373_p2, %p1372_p4 }
  0x7f   : > { %p1370_p0 = pneg %p1369_p6 }
  0x80   : > { %p1376_p8 = por %p1375_p5, %p1374_p9 }
  0x82   : > { %p1377_p1 = pnand %p1376_p8, %p1370_p0 }
  0x84   : > { %1380 = shalt.err (!%p1377_p1)
}
  0x85   : > { %s1381_s23 = scalar_lea.vmem %s1874_s28, 256  ;;  %s1557_s24 = smov [#allocation10]  }
  0x86   : > { %p1382_p3 = scmp.ne.s32.totalorder %s1874_s28, %s1381_s23  ;;  %s1386_s27 = sshll.u32 %s1557_s24, 4  ;;  %s1387_s27 = int_to_ptr.vmem [resolvable:$false] %s1386_s27 }
  0x87   : > { %s1388_s22 = scalar_lea.vmem %s1387_s27, 512  ;;  %p1389_p6 = scmp.lt.s32.totalorder %s1874_s28, %s1387_s27 }
  0x88   : > { %p1384_p12 = pnand %p1382_p3, %p1368_p13  ;;  %p1390_p4 = scmp.lt.s32.totalorder %s1388_s22, %s1381_s23 }
  0x8a   : > { %p1385_p7 = pneg %p1384_p12  ;;  %p1391_p2 = por %p1390_p4, %p1389_p6 }
  0x8c   : > { %p1392_p9 = pnand %p1391_p2, %p1385_p7 }
  0x8e   : > { %1395 = shalt.err (!%p1392_p9)
}
  0x8f   : > { %1144 = dma.hbm_to_vmem [thread:$0]  (!%p1870_p10), %s1866_s1, 256, %s1874_s28, %s1724_s21, %s2136_s3, %s2136_s3, %s2135_s4  }
  0x90   : > { %p2142_p13 = scmp.ne.s32.totalorder %s2125_s9, 0 }
  0x91   : > { %s1907_s10 = sand.u32 (!%p2142_p13), 1, %s1527_s19   ;;  %p2143_p0 = scmp.ne.s32.totalorder (!%p2142_p13), %s2129_s30, 0 }
  0x92   : > { %266 = sbr.rel (%p2142_p13) target bundleno = 877 (0x36d), region = 32  ;;  %s965_s11 = sshll.u32 (!%p2142_p13), %s1907_s10, 4 }
  0x93   : > { %s269_s15 = scalar_lea.sflag (!%p2142_p13), [#allocation6], %s1907_s10  ;;  %s272_s12 = scalar_lea.vmem (!%p2142_p13), [#allocation5], %s965_s11 }
  0x99   : > { %1482 = dma.done.wait (%p2143_p0), %s269_s15, 256  }
  0x9a   : > { %1484 = vsyncadd (%p2143_p0), %s269_s15, 4294967040  ;;  %s2144_s21 = sld [smem:[#allocation16_spill]]  ;;  %s277_s4 = sand.u32 1, %s1654_s26  }
  0x9b   : > { %s2145_s9 = sld [smem:[#allocation23_spill]]  ;;  %s278_s28 = scalar_lea.sflag [#allocation9], %s277_s4 }
  0xa0   : > { %s279_s3 = sand.u32 1, %s2144_s21  }
  0xa1   : > { %s966_s1 = sshll.u32 %s279_s3, 4  ;;  %p2146_p10 = scmp.ne.s32.totalorder %s2145_s9, 0 }
  0xa2   : > { %s281_s8 = scalar_lea.vmem [#allocation8], %s966_s1 }
  0xa3   : > { %1486 = dma.done.wait (%p2146_p10), %s278_s28, 256  }
  0xa4   : > { %1488 = vsyncadd (%p2146_p10), %s278_s28, 4294967040  ;;  %s288_s6 = sand.u32 1, %s1503_s13  }
  0xa5   : > { %s1924_s23 = sshll.u32 %s288_s6, 4 }
  0xa6   : > { %s290_s30 = scalar_lea.vmem [#allocation10], %s1924_s23 }
  0xa7   : > { %1490 = dma.done.wait (%p1862_p11), %s278_s28, 256  }
  0xa8   : > { %1492 = vsyncadd (%p1862_p11), %s278_s28, 4294967040  ;;  %v341_v0 = vld [vmem:[%s281_s8] sm:$0xff]  ;;  %v338_v2 = vld [vmem:[%s272_s12 + $0x8] sm:$0xff]  ;;  %vm377_vm0 = vcmask 130048   ;;  %v1558_v23 = vmov -inf   ;;  %v1559_v24 = vmov 0.0   ;;  %v598_v59 = vlaneseq }
  0xa9   : > { %v337_v1 = vld [vmem:[%s272_s12] sm:$0xff]  ;;  %345 = vxpose.xlu0.b32.start [1/2] (short) %v341_v0, 128  ;;  %v342_v4 = vld [vmem:[%s281_s8 + $0x8] sm:$0xff]  ;;  %v340_v5 = vmul.f32 0.25, %v338_v2  ;;  %333 = vst [vmem:[#allocation2] sm:$0x1] %v1558_v23  ;;  %s2147_s0 = sld [smem:[#allocation17_spill]] }
  0xaa   : > { %v339_v3 = vmul.f32 0.25, %v337_v1  ;;  %334 = vst [vmem:[#allocation3] sm:$0x1] %v1559_v24  ;;  %v343_v29 = vld [vmem:[%s290_s30] sm:$0xff]  ;;  %v599_v62 = vshrl.u32 %v598_v59, 7  ;;  %s2148_s26 = sld [smem:[#allocation18_spill]] }
  0xab   : > { %1087 = vmatprep.mubr.f32.mxu1 %v343_v29  ;;  %s322_s15 = scalar_lea.vmem [#allocation11], %s965_s11  ;;  %s2149_s3 = sld [smem:[#allocation27_spill]] }
  0xac   : > { %v1090_v6 = vpack.c.bf16 %v340_v5, %v339_v3  ;;  %v1975_v2 = vsub.s32 0, %v599_v62  ;;  %s800_s12 = sshll.u32 %s322_s15, 4  ;;  %s784_s1 = scalar_lea.sflag [#allocation7], %s1907_s10  ;;  %s2001_s12 = int_to_ptr.vmem [resolvable:$true] %s800_s12 }
  0xad   : > { %346 = vxpose.xlu0.b32.end [2/2] (short) %v342_v4, 128  ;;  %s1397_s28 = scalar_lea.vmem %s2001_s12, 256  ;;  %p2150_p5 = scmp.ne.s32.totalorder %s2130_s7, 0 }
  0xae   : > { %1091 = vmatprep.subr.bf16.mxu0 %v1090_v6  ;;  %p1398_p11 = scmp.ne.s32.totalorder %s2001_s12, %s1397_s28  ;;  %s1560_s8 = smov [#allocation11]  }
  0xaf   : > { %1093 = vmatpush3.bf16.msra.mxu0 %v1090_v6  ;;  %s986_s24 = sshll.u32 %s2147_s0, 1  ;;  %s1401_s6 = sshll.u32 %s1560_s8, 4  ;;  %s1402_s6 = int_to_ptr.vmem [resolvable:$false] %s1401_s6 }
  0xb0   : > { %v1973_v0 = vld [vmem:[#allocation2] sm:$0x1]  ;;  %s987_s27 = sshll.u32 %s2148_s26, 2  ;;  %p1399_p8 = pnand %p1398_p11, %p2150_p5 }
  0xb1   : > { %s797_s22 = sadd.s32 %s987_s27, %s986_s24  ;;  %s1403_s23 = scalar_lea.vmem %s1402_s6, 512 }
  0xb2   : > { %s988_s21 = sshll.u32 %s797_s22, 7  ;;  %p1400_p1 = pneg %p1399_p8 }
  0xb3   : > { %s2006_s11 = scalar_lea.hbm %s2149_s3, %s988_s21  ;;  %p1404_p3 = scmp.lt.s32.totalorder %s2001_s12, %s1402_s6 }
  0xb4   : > { %p1405_p12 = scmp.lt.s32.totalorder %s1403_s23, %s1397_s28 }
  0xb6   : > { %p1406_p7 = por %p1405_p12, %p1404_p3 }
  0xb8   : > { %p1407_p6 = pnand %p1406_p7, %p1400_p1 }
 0x129   : > { %v361_v7 = vpop.trf.xlu0 }
 0x12a   : > { %1031 = vmatprep.mubr.msk.f32.mxu0 %vm377_vm0, %v361_v7 }
 0x12d   : > { %v362_v8 = vpop.trf.xlu0 }
 0x12e   : > { %1032 = vmatmul.mubr.msk.f32.vlgmr.msra.gmra.mrb[0].mxu0 %vm377_vm0, %v362_v8 }
 0x131   : > { %v363_v9 = vpop.trf.xlu0 }
 0x132   : > { %1034 = vmatprep.mubr.msk.f32.mxu0 %vm377_vm0, %v363_v9 }
 0x135   : > { %v364_v10 = vpop.trf.xlu0 }
 0x136   : > { %1035 = vmatmul.mubr.msk.f32.gmra.mrb[2].mxu0 %vm377_vm0, %v364_v10 }
 0x139   : > { %v365_v11 = vpop.trf.xlu0 }
 0x13a   : > { %1037 = vmatprep.mubr.msk.f32.mxu0 %vm377_vm0, %v365_v11 }
 0x13d   : > { %v366_v12 = vpop.trf.xlu0 }
 0x13e   : > { %1038 = vmatmul.mubr.msk.f32.gmra.mrb[4].mxu0 %vm377_vm0, %v366_v12 }
 0x141   : > { %v367_v13 = vpop.trf.xlu0 }
 0x142   : > { %1040 = vmatprep.mubr.msk.f32.mxu0 %vm377_vm0, %v367_v13 }
 0x145   : > { %v368_v14 = vpop.trf.xlu0 }
 0x146   : > { %1041 = vmatmul.mubr.msk.f32.gmra.mrb[6].mxu0 %vm377_vm0, %v368_v14 }
 0x149   : > { %v369_v15 = vpop.trf.xlu0 }
 0x14a   : > { %1043 = vmatprep.mubr.msk.f32.mxu0 %vm377_vm0, %v369_v15 }
 0x14d   : > { %v370_v16 = vpop.trf.xlu0 }
 0x14e   : > { %1044 = vmatmul.mubr.msk.f32.gmra.mrb[8].mxu0 %vm377_vm0, %v370_v16 }
 0x151   : > { %v371_v17 = vpop.trf.xlu0 }
 0x152   : > { %1046 = vmatprep.mubr.msk.f32.mxu0 %vm377_vm0, %v371_v17 }
 0x155   : > { %v372_v18 = vpop.trf.xlu0 }
 0x156   : > { %1047 = vmatmul.mubr.msk.f32.gmra.mrb[10].mxu0 %vm377_vm0, %v372_v18 }
 0x159   : > { %v373_v19 = vpop.trf.xlu0 }
 0x15a   : > { %1049 = vmatprep.mubr.msk.f32.mxu0 %vm377_vm0, %v373_v19 }
 0x15d   : > { %v374_v20 = vpop.trf.xlu0 }
 0x15e   : > { %1050 = vmatmul.mubr.msk.f32.gmra.mrb[12].mxu0 %vm377_vm0, %v374_v20 }
 0x161   : > { %v375_v21 = vpop.trf.xlu0 }
 0x162   : > { %1052 = vmatprep.mubr.msk.f32.mxu0 %vm377_vm0, %v375_v21 }
 0x165   : > { %v376_v22 = vpop.trf.xlu0 }
 0x166   : > { %1053 = vmatmul.mubr.msk.f32.gmra.mrb[14].mxu0 %vm377_vm0, %v376_v22 }
 0x201   : > { %v1947_v25 = vpop.f32.mrb[0].mxu0 }
 0x202   : > { %v492_v26 = vpop.f32.mrb[1].mxu0 }
 0x209   : > { %v1949_v27 = vpop.f32.mrb[2].mxu0 }
 0x20a   : > { %v502_v28 = vpop.f32.mrb[3].mxu0 }
 0x211   : > { %v1953_v30 = vpop.f32.mrb[4].mxu0 }
 0x212   : > { %v573_v31 = vmax.f32 %v1947_v25, %v1953_v30  ;;  %v512_v32 = vpop.f32.mrb[5].mxu0 }
 0x213   : > { %v572_v33 = vmax.f32 %v492_v26, %v512_v32 }
 0x219   : > { %v1957_v34 = vpop.f32.mrb[6].mxu0 }
 0x21a   : > { %v575_v35 = vmax.f32 %v1949_v27, %v1957_v34  ;;  %v522_v36 = vpop.f32.mrb[7].mxu0 }
 0x21b   : > { %v574_v37 = vmax.f32 %v502_v28, %v522_v36 }
 0x221   : > { %v1961_v38 = vpop.f32.mrb[8].mxu0 }
 0x222   : > { %v577_v39 = vmax.f32 %v573_v31, %v1961_v38  ;;  %v532_v40 = vpop.f32.mrb[9].mxu0 }
 0x223   : > { %v576_v41 = vmax.f32 %v572_v33, %v532_v40 }
 0x229   : > { %v1964_v42 = vpop.f32.mrb[10].mxu0 }
 0x22a   : > { %v579_v43 = vmax.f32 %v575_v35, %v1964_v42  ;;  %v542_v44 = vpop.f32.mrb[11].mxu0 }
 0x22b   : > { %v578_v45 = vmax.f32 %v574_v37, %v542_v44 }
 0x231   : > { %v1967_v46 = vpop.f32.mrb[12].mxu0 }
 0x232   : > { %v581_v47 = vmax.f32 %v577_v39, %v1967_v46  ;;  %v552_v48 = vpop.f32.mrb[13].mxu0 }
 0x233   : > { %v580_v49 = vmax.f32 %v576_v41, %v552_v48 }
 0x235   : > { %v584_v50 = vmax.f32 %v580_v49, %v581_v47 }
 0x239   : > { %v1970_v51 = vpop.f32.mrb[14].mxu0 }
 0x23a   : > { %v583_v52 = vmax.f32 %v579_v43, %v1970_v51  ;;  %v562_v53 = vpop.f32.mrb[15].mxu0 }
 0x23b   : > { %v582_v54 = vmax.f32 %v578_v45, %v562_v53 }
 0x23d   : > { %v585_v55 = vmax.f32 %v582_v54, %v583_v52 }
 0x23f   : > { %v586_v56 = vmax.f32 %v584_v50, %v585_v55 }
 0x241   : > { %v587_v57 = vrot.slane %v586_v56, 4 }
 0x243   : > { %v588_v58 = vmax.f32 %v586_v56, %v587_v57 }
 0x245   : > { %v589_v60 = vrot.slane %v588_v58, 2 }
 0x247   : > { %v590_v61 = vmax.f32 %v588_v58, %v589_v60 }
 0x249   : > { %v591_v63 = vrot.slane %v590_v61, 1 }
 0x24b   : > { %v592_v1 = vmax.f32 %v590_v61, %v591_v63 }
 0x24d   : > { %v1978_v3 = vmax.f32 %v1973_v0, %v592_v1 }
 0x24f   : > { %v601_v4 = vrot.slane %v1978_v3, %v1975_v2  ;;  %765 = vst [vmem:[#allocation2] sm:$0x1] %v1978_v3 }
 0x251   : > { %v603_v5 = vsub.f32 %v492_v26, %v601_v4  ;;  %v604_v6 = vsub.f32 %v1947_v25, %v601_v4  ;;  %v605_v7 = vsub.f32 %v502_v28, %v601_v4  ;;  %v606_v8 = vsub.f32 %v1949_v27, %v601_v4 }
 0x252   : > { %v607_v9 = vsub.f32 %v512_v32, %v601_v4  ;;  %v608_v10 = vsub.f32 %v1953_v30, %v601_v4  ;;  %v609_v11 = vsub.f32 %v522_v36, %v601_v4  ;;  %v610_v12 = vsub.f32 %v1957_v34, %v601_v4 }
 0x253   : > { %v611_v13 = vsub.f32 %v532_v40, %v601_v4  ;;  %v612_v14 = vsub.f32 %v1961_v38, %v601_v4  ;;  %v613_v15 = vsub.f32 %v542_v44, %v601_v4  ;;  %v614_v16 = vsub.f32 %v1964_v42, %v601_v4 }
 0x254   : > { %v615_v17 = vsub.f32 %v552_v48, %v601_v4  ;;  %v616_v18 = vsub.f32 %v1967_v46, %v601_v4  ;;  %v617_v19 = vsub.f32 %v562_v53, %v601_v4  ;;  %v618_v20 = vsub.f32 %v1970_v51, %v601_v4 }
 0x255   : > { %v619_v21 = vmul.f32 1.442695, %v603_v5  ;;  %v621_v22 = vmul.f32 1.442695, %v604_v6  ;;  %v623_v23 = vmul.f32 1.442695, %v605_v7 }
 0x256   : > { %v625_v24 = vmul.f32 1.442695, %v606_v8  ;;  %v627_v25 = vmul.f32 1.442695, %v607_v9  ;;  %v629_v26 = vmul.f32 1.442695, %v608_v10  ;;  %v594_v10 = vsub.f32 %v1973_v0, %v1978_v3 }
 0x257   : > { %1269 = vpow2.f32 %v619_v21  ;;  %v631_v27 = vmul.f32 1.442695, %v609_v11  ;;  %v633_v28 = vmul.f32 1.442695, %v610_v12  ;;  %v635_v29 = vmul.f32 1.442695, %v611_v13 }
 0x258   : > { %1271 = vpow2.f32 %v621_v22  ;;  %v637_v30 = vmul.f32 1.442695, %v612_v14  ;;  %v639_v31 = vmul.f32 1.442695, %v613_v15  ;;  %v641_v32 = vmul.f32 1.442695, %v614_v16 }
 0x259   : > { %1273 = vpow2.f32 %v623_v23  ;;  %v643_v33 = vmul.f32 1.442695, %v615_v17  ;;  %v645_v34 = vmul.f32 1.442695, %v616_v18  ;;  %v647_v36 = vmul.f32 1.442695, %v617_v19 }
 0x25a   : > { %1275 = vpow2.f32 %v625_v24  ;;  %v649_v38 = vmul.f32 1.442695, %v618_v20  ;;  %v595_v13 = vmul.f32 1.442695, %v594_v10  ;;  %v344_v18 = vld [vmem:[%s290_s30 + $0x8] sm:$0xff] }
 0x25b   : > { %1277 = vpow2.f32 %v627_v25  ;;  %v651_v21 = vld [vmem:[#allocation3] sm:$0x1] }
 0x25c   : > { %1279 = vpow2.f32 %v629_v26 }
 0x25d   : > { %1281 = vpow2.f32 %v631_v27 }
 0x25e   : > { %1283 = vpow2.f32 %v633_v28 }
 0x25f   : > { %1285 = vpow2.f32 %v635_v29 }
 0x260   : > { %1287 = vpow2.f32 %v637_v30 }
 0x261   : > { %v1270_v35 = vpop.eup %1269  ;;  %1289 = vpow2.f32 %v639_v31 }
 0x262   : > { %v1272_v37 = vpop.eup %1271  ;;  %1291 = vpow2.f32 %v641_v32 }
 0x263   : > { %v1274_v39 = vpop.eup %1273  ;;  %1293 = vpow2.f32 %v643_v33  ;;  %v653_v40 = vadd.f32 %v1272_v37, %v1270_v35  ;;  %v1094_v41 = vpack.c.bf16 %v1272_v37, %v1270_v35 }
 0x264   : > { %v1276_v42 = vpop.eup %1275  ;;  %1295 = vpow2.f32 %v645_v34 }
 0x265   : > { %v1278_v43 = vpop.eup %1277  ;;  %1297 = vpow2.f32 %v647_v36  ;;  %v654_v44 = vadd.f32 %v1274_v39, %v653_v40  ;;  %1095 = vmatprep.subr.bf16.mxu1 %v1094_v41  ;;  %v1098_v45 = vpack.c.bf16 %v1276_v42, %v1274_v39 }
 0x266   : > { %v1280_v46 = vpop.eup %1279  ;;  %1299 = vpow2.f32 %v649_v38  ;;  %1097 = vmatpush3.bf16.msra.mxu1 %v1094_v41 }
 0x267   : > { %v1282_v47 = vpop.eup %1281  ;;  %v655_v48 = vadd.f32 %v1276_v42, %v654_v44  ;;  %1099 = vmatprep.subr.bf16.mxu1 %v1098_v45  ;;  %v1102_v49 = vpack.c.bf16 %v1280_v46, %v1278_v43  ;;  %1301 = vpow2.f32 %v595_v13 }
 0x268   : > { %v1284_v50 = vpop.eup %1283 }
 0x269   : > { %v1286_v51 = vpop.eup %1285  ;;  %v656_v52 = vadd.f32 %v1278_v43, %v655_v48  ;;  %v1106_v53 = vpack.c.bf16 %v1284_v50, %v1282_v47 }
 0x26a   : > { %v1288_v54 = vpop.eup %1287  ;;  %1101 = vmatpush3.bf16.msra.mxu1 %v1098_v45 }
 0x26b   : > { %v1290_v55 = vpop.eup %1289  ;;  %v657_v56 = vadd.f32 %v1280_v46, %v656_v52  ;;  %1103 = vmatprep.subr.bf16.mxu1 %v1102_v49  ;;  %v1110_v57 = vpack.c.bf16 %v1288_v54, %v1286_v51 }
 0x26c   : > { %v1292_v58 = vpop.eup %1291 }
 0x26d   : > { %v1294_v59 = vpop.eup %1293  ;;  %v658_v60 = vadd.f32 %v1282_v47, %v657_v56  ;;  %v1114_v61 = vpack.c.bf16 %v1292_v58, %v1290_v55 }
 0x26e   : > { %v1296_v62 = vpop.eup %1295  ;;  %1105 = vmatpush3.bf16.msra.mxu1 %v1102_v49 }
 0x26f   : > { %v1298_v63 = vpop.eup %1297  ;;  %v659_v1 = vadd.f32 %v1284_v50, %v658_v60  ;;  %1107 = vmatprep.subr.bf16.mxu1 %v1106_v53  ;;  %v1118_v4 = vpack.c.bf16 %v1296_v62, %v1294_v59 }
 0x270   : > { %v1300_v5 = vpop.eup %1299 }
 0x271   : > { %v660_v6 = vadd.f32 %v1286_v51, %v659_v1  ;;  %v1122_v7 = vpack.c.bf16 %v1300_v5, %v1298_v63  ;;  %v1302_v20 = vpop.eup %1301 }
 0x272   : > { %1109 = vmatpush3.bf16.msra.mxu1 %v1106_v53  ;;  %v652_v24 = vmul.f32 %v1302_v20, %v651_v21  ;;  %v682_v27 = vrot.slane %v1302_v20, %v1975_v2 }
 0x273   : > { %v661_v8 = vadd.f32 %v1288_v54, %v660_v6  ;;  %1111 = vmatprep.subr.bf16.mxu1 %v1110_v57 }
 0x274   : > { %v684_v29 = vmul.f32 0.0, %v682_v27 }
 0x275   : > { %v662_v9 = vadd.f32 %v1290_v55, %v661_v8 }
 0x276   : > { %1113 = vmatpush3.bf16.msra.mxu1 %v1110_v57 }
 0x277   : > { %v663_v11 = vadd.f32 %v1292_v58, %v662_v9  ;;  %1115 = vmatprep.subr.bf16.mxu1 %v1114_v61 }
 0x279   : > { %v664_v12 = vadd.f32 %v1294_v59, %v663_v11 }
 0x27a   : > { %1117 = vmatpush3.bf16.msra.mxu1 %v1114_v61 }
 0x27b   : > { %v665_v14 = vadd.f32 %v1296_v62, %v664_v12  ;;  %1119 = vmatprep.subr.bf16.mxu1 %v1118_v4 }
 0x27d   : > { %v666_v15 = vadd.f32 %v1298_v63, %v665_v14 }
 0x27e   : > { %1121 = vmatpush3.bf16.msra.mxu1 %v1118_v4 }
 0x27f   : > { %v667_v16 = vadd.f32 %v1300_v5, %v666_v15  ;;  %1123 = vmatprep.subr.bf16.mxu1 %v1122_v7 }
 0x281   : > { %v668_v17 = vrot.slane %v667_v16, 4 }
 0x282   : > { %1125 = vmatpush3.bf16.msra.mxu1 %v1122_v7 }
 0x283   : > { %v669_v19 = vadd.f32 %v668_v17, %v667_v16 }
 0x285   : > { %v670_v0 = vrot.slane %v669_v19, 2  ;;  %1088 = vmatmul.mubr.f32.vlgmr.msra.gmra.mrb[0].mxu1 %v344_v18 }
 0x287   : > { %v671_v3 = vadd.f32 %v670_v0, %v669_v19 }
 0x289   : > { %v672_v22 = vrot.slane %v671_v3, 1 }
 0x28b   : > { %v673_v23 = vadd.f32 %v672_v22, %v671_v3 }
 0x28d   : > { %v674_v25 = vadd.f32 %v673_v23, %v652_v24 }
 0x28f   : > { %675 = vst [vmem:[#allocation3] sm:$0x1] %v674_v25 }
 0x296   : > { %v769_v26 = vld [vmem:[#allocation3] sm:$0x1] }
 0x297   : > { %1303 = vrcp.f32 %v769_v26 }
 0x2a1   : > { %v1304_v28 = vpop.eup %1303 }
 0x2a2   : > { %v777_v32 = vrot.slane %v1304_v28, %v1975_v2 }
 0x358   : > { %v1089_v30 = vpop.f32.mrb[0].mxu1 }
 0x359   : > { %v762_v31 = vadd.f32 %v1089_v30, %v684_v29  ;;  %v752_v33 = vpop.f32.mrb[1].mxu1 }
 0x35a   : > { %v761_v34 = vadd.f32 %v752_v33, %v684_v29 }
 0x35b   : > { %v780_v35 = vmul.f32 %v777_v32, %v762_v31 }
 0x35c   : > { %v779_v36 = vmul.f32 %v777_v32, %v761_v34 }
 0x35d   : > { %782 = vst [vmem:[%s322_s15 + $0x8] sm:$0xff] %v780_v35 }
 0x35e   : > { %781 = vst [vmem:[%s322_s15] sm:$0xff] %v779_v36 }
 0x35f   : > { %1410 = shalt.err (!%p1407_p6)
}
 0x360   : > { %s1411_s30 = scalar_lea.hbm %s2006_s11, 256  ;;  %s1415_s24 = scalar_lea.hbm %s2149_s3, 1024 }
 0x361   : > { %p1412_p4 = scmp.ne.s32.totalorder %s2006_s11, %s1411_s30  ;;  %p1416_p13 = scmp.lt.u32.totalorder %s2006_s11, %s2149_s3 }
 0x362   : > { %p1417_p0 = scmp.lt.u32.totalorder %s1415_s24, %s1411_s30  ;;  %p1419_p11 = scmp.lt.u32.totalorder %s1411_s30, %s2006_s11 }
 0x363   : > { %p1413_p2 = pnand %p1412_p4, %p2150_p5 }
 0x364   : > { %p1418_p10 = por %p1417_p0, %p1416_p13 }
 0x365   : > { %p1414_p9 = pneg %p1413_p2 }
 0x366   : > { %p1420_p8 = por %p1419_p11, %p1418_p10 }
 0x368   : > { %p1421_p1 = pnand %p1420_p8, %p1414_p9 }
 0x36a   : > { %1424 = shalt.err (!%p1421_p1)
}
 0x36b   : > { %s1561_s15 = smov 128   ;;  %s1562_s21 = smov 8  }
 0x36c   : > { %1133 = dma.vmem_to_hbm [thread:$0]  (%p2150_p5), %s2001_s12, 256, %s2006_s11, %s784_s1, %s1561_s15, %s1561_s15, %s1562_s21  }
 0x36d PF: > { %p1150_p3 = scmp.ge.s32.totalorder %s1551_s25, 2  ;;  %s815_s9 = sand.u32 1, %s1523_s18  }
 0x36e   : > { %p2151_p12 = scmp.ne.s32.totalorder %s2131_s5, 0  ;;  %s816_s4 = scalar_lea.sflag [#allocation7], %s815_s9 }
 0x370   : > { %p1146_p7 = pnand %p1150_p3, %p2151_p12 }
 0x372   : > { %1494 = dma.done.wait (!%p1146_p7), %s816_s4, 256  }
 0x373   : > { %1496 = vsyncadd (!%p1146_p7), %s816_s4, 4294967040  ;;  %s22_s25 = sadd.s32 1, %s1551_s25   ;;  %s2153_s15 = sld [smem:[#allocation16_spill]] }
 0x374   : > { %p2037_p6 = scmp.ge.s32.totalorder %s22_s25, 6   ;;  %s2154_s7 = sld [smem:[#allocation24_spill]] }
 0x375   : > { %s2155_s10 = smov %s1779_s16  ;;  %s2156_s21 = sld [smem:[#allocation19_spill]] }
 0x376   : > { %s2157_s22 = sld [smem:[#allocation20_spill]]  ;;  %s2158_s23 = sld [smem:[#allocation21_spill]] }
 0x377   : > { %s2159_s24 = sld [smem:[#allocation22_spill]]  ;;  %s2160_s12 = smov %s1503_s13 }
 0x378   : > { %s2161_s13 = smov %s1507_s14  ;;  %s2162_s14 = smov %s1847_s29 }
 0x379   : > { %s2163_s16 = smov %s1519_s17  ;;  %s2165_s18 = smov %s1527_s19 }
 0x37a   : > { %s2164_s17 = smov %s2154_s7  ;;  %s2166_s19 = smov %s1531_s20 }
 0x37b   : > { %s2167_s20 = smov %s2155_s10  ;;  %21 = sbr.rel (!%p2037_p6) target bundleno = 16 (0x10), region = 109 }
 0x382   :  { %821 = vsyncpa [#allocation6], 1 }
 0x383   :  { %823 = vsyncpa [#allocation6 + $0x1], 1 }
 0x384   :  { %824 = vsyncpa [#allocation9], 1 }
 0x385   :  { %826 = vsyncpa [#allocation9 + $0x1], 1 }
 0x386   :  { %827 = vsyncpa [#allocation7], 1 }
 0x387   :  { %829 = vsyncpa [#allocation7 + $0x1], 1 }

</bundles_post_ra>
